<compile_context>
chip_gen: v7x
topology: tpu7x:2x2x1
jax: 0.10.0
libtpu: 0.0.40
codegen_flags: <defaults>
</compile_context>

<pallas_src>
import jax
import jax.numpy as jnp
from jax.experimental import pallas as pl
from jax.experimental.pallas import tpu as pltpu


def nam_kernel(x_ref, w1e_ref, b1_ref, w2_ref, b2_ref, w3_ref, b3_ref,
               wout_ref, bout_ref, o_ref):
    # Layer 1: per-feature scalar -> N, folded into an (F, F*N) expansion matmul.
    x = x_ref[...].astype(w1e_ref.dtype)                                   # (Bt, F) bf16
    h = jnp.dot(x, w1e_ref[...], preferred_element_type=jnp.float32) + b1_ref[...]
    h = jnp.maximum(h, 0.0)                                                # (Bt, F*N) f32

    # Layer 2: block-diagonal (F*N, F*N) matmul, bf16 operands, f32 accumulation.
    h = jnp.dot(h.astype(w2_ref.dtype), w2_ref[...],
                preferred_element_type=jnp.float32) + b2_ref[...]
    h = jnp.maximum(h, 0.0)

    # Layer 3: block-diagonal (F*N, F*N) matmul.
    h = jnp.dot(h.astype(w3_ref.dtype), w3_ref[...],
                preferred_element_type=jnp.float32) + b3_ref[...]
    h = jnp.maximum(h, 0.0)

    # Fused BlockLinear(F,N,1) + Linear(F,1): one (F*N, 1) matmul, f32.
    o_ref[...] = jnp.dot(h, wout_ref[...],
                         preferred_element_type=jnp.float32) + bout_ref[...]   # (Bt, 1)


def prepare_weights(params, matmul_dtype=jnp.bfloat16):
    """Precompute expansion / block-diagonal / fused-head weights in a lane-dense layout."""
    (w1, b1, w2, b2, w3, b3, w4, b4, wlr, blr) = params
    F, N = w1.shape
    FN = F * N
    eye = jnp.eye(F, dtype=jnp.float32)

    # Layer-1 expansion:  W1e[f, g*N+n] = w1[g, n] if f == g else 0
    #   so (x @ W1e)[b, g*N+n] = x[b, g] * w1[g, n]
    w1e = jnp.einsum('fg,gn->fgn', eye, w1).reshape(F, FN).astype(matmul_dtype)
    b1f = b1.reshape(1, FN).astype(jnp.float32)

    # Block-diagonal:  W_bd[f*N+n, g*N+m] = w[f, n, m] if f == g else 0
    w2bd = jnp.einsum('fg,fnm->fngm', eye, w2).reshape(FN, FN).astype(matmul_dtype)
    w3bd = jnp.einsum('fg,fnm->fngm', eye, w3).reshape(FN, FN).astype(matmul_dtype)
    b2f = b2.reshape(1, FN).astype(jnp.float32)
    b3f = b3.reshape(1, FN).astype(jnp.float32)

    # Fuse BlockLinear(F,N,1) with Linear(F,1):
    #   out = sum_{f,n} h[b,f,n] * w4[f,n] * wlr[f] + (b4 @ wlr + blr)
    wout = (w4 * wlr.reshape(F, 1)).reshape(FN, 1).astype(jnp.float32)
    bout = (b4 @ wlr + blr).astype(jnp.float32)                            # (1, 1)

    return (w1e, b1f, w2bd, b2f, w3bd, b3f, wout, bout)


def nam_forward(x, params, *, block_b=512, matmul_dtype=jnp.bfloat16):
    flat = prepare_weights(params, matmul_dtype)
    (w1e, b1f, w2bd, b2f, w3bd, b3f, wout, bout) = flat
    B, F = x.shape
    FN = w2bd.shape[0]

    # Batch tile: as large as reasonable (amortize per-step overhead), clamped to B.
    block_b = max(8, min(block_b, ((B + 7) // 8) * 8))
    grid_b = pl.cdiv(B, block_b)
    B_pad = grid_b * block_b
    if B_pad != B:
        x = jnp.pad(x, ((0, B_pad - B), (0, 0)))

    const = lambda i: (0, 0)   # weights: same block every step -> stay VMEM resident

    out = pl.pallas_call(
        nam_kernel,
        out_shape=jax.ShapeDtypeStruct((B_pad, 1), jnp.float32),
        grid=(grid_b,),
        in_specs=[
            pl.BlockSpec((block_b, F), lambda i: (i, 0)),     # x, batch-tiled, raw (B, F)
            pl.BlockSpec((F, FN), const),                     # layer-1 expansion weight (bf16)
            pl.BlockSpec((1, FN), const),                     # b1
            pl.BlockSpec((FN, FN), const),                    # w2 block-diagonal (bf16)
            pl.BlockSpec((1, FN), const),                     # b2
            pl.BlockSpec((FN, FN), const),                    # w3 block-diagonal (bf16)
            pl.BlockSpec((1, FN), const),                     # b3
            pl.BlockSpec((FN, 1), const),                     # fused head weight (f32)
            pl.BlockSpec((1, 1), const),                      # fused head bias (f32)
        ],
        out_specs=pl.BlockSpec((block_b, 1), lambda i: (i, 0)),
        compiler_params=pltpu.CompilerParams(
            dimension_semantics=("parallel",),
        ),
    )(x, w1e, b1f, w2bd, b2f, w3bd, b3f, wout, bout)

    return out[:B]


def nam_reference(x, params):
    """Pure-f32 reference with the original (B, F, N) per-feature semantics."""
    (w1, b1, w2, b2, w3, b3, w4, b4, wlr, blr) = params
    h = jnp.maximum(x[:, :, None] * w1[None] + b1[None], 0.0)
    h = jnp.maximum(jnp.einsum('bfn,fnm->bfm', h, w2) + b2[None], 0.0)
    h = jnp.maximum(jnp.einsum('bfn,fnm->bfm', h, w3) + b3[None], 0.0)
    x_pre = jnp.sum(h * w4[None], axis=-1) + b4
    return x_pre @ wlr + blr


def nam_reference_flat(x, flat, matmul_dtype=jnp.bfloat16):
    """Mirrors the kernel math exactly (flat layout + bf16 matmuls) for a tight check."""
    (w1e, b1f, w2bd, b2f, w3bd, b3f, wout, bout) = flat
    h = jnp.maximum(jnp.dot(x.astype(matmul_dtype), w1e,
                            preferred_element_type=jnp.float32) + b1f, 0.0)
    h = jnp.maximum(jnp.dot(h.astype(matmul_dtype), w2bd,
                            preferred_element_type=jnp.float32) + b2f, 0.0)
    h = jnp.maximum(jnp.dot(h.astype(matmul_dtype), w3bd,
                            preferred_element_type=jnp.float32) + b3f, 0.0)
    return jnp.dot(h, wout, preferred_element_type=jnp.float32) + bout


def init_params(key, n_features, n_nodes):
    ks = jax.random.split(key, 10)
    F, N = n_features, n_nodes
    w1 = jax.random.normal(ks[0], (F, N), jnp.float32) * 0.5          # BlockLinear(F,1,N)
    b1 = jax.random.normal(ks[1], (F, N), jnp.float32) * 0.1
    w2 = jax.random.normal(ks[2], (F, N, N), jnp.float32) * (1.0 / N ** 0.5)
    b2 = jax.random.normal(ks[3], (F, N), jnp.float32) * 0.1
    w3 = jax.random.normal(ks[4], (F, N, N), jnp.float32) * (1.0 / N ** 0.5)
    b3 = jax.random.normal(ks[5], (F, N), jnp.float32) * 0.1
    w4 = jax.random.normal(ks[6], (F, N), jnp.float32) * (1.0 / N ** 0.5)  # BlockLinear(F,N,1)
    b4 = jax.random.normal(ks[7], (1, F), jnp.float32) * 0.1
    wlr = jax.random.normal(ks[8], (F, 1), jnp.float32) * (1.0 / F ** 0.5)
    blr = jax.random.normal(ks[9], (1, 1), jnp.float32) * 0.1
    return (w1, b1, w2, b2, w3, b3, w4, b4, wlr, blr)


if __name__ == "__main__":
    n_features, n_nodes, batch = 4, 32, 256   # F*N = 128 -> one lane width
    key = jax.random.PRNGKey(0)
    kx, kp = jax.random.split(key)
    x = jax.random.normal(kx, (batch, n_features), jnp.float32)
    params = init_params(kp, n_features, n_nodes)

    out = jax.block_until_ready(nam_forward(x, params))
    assert out.shape == (batch, 1)

    # Tight check against a reference mirroring the kernel's flat/bf16 math.
    flat = prepare_weights(params)
    ref_flat = nam_reference_flat(x, flat)
    assert jnp.allclose(out, ref_flat, atol=1e-3, rtol=1e-3), "mismatch vs flat reference"

    # Looser check against the original pure-f32 per-feature semantics (bf16 matmul noise).
    ref_f32 = nam_reference(x, params)
    assert jnp.allclose(out, ref_f32, atol=4e-2, rtol=2e-2), "mismatch vs f32 reference"

    print("KERNEL_OK")
</pallas_src>

<mosaic_0001>
module attributes {stable_mosaic.version = 11 : i64} {
  func.func @nam_kernel(%arg0: i32, %arg1: memref<256x4xf32, #tpu.memory_space<vmem>>, %arg2: memref<4x128xbf16, #tpu.memory_space<vmem>>, %arg3: memref<1x128xf32, #tpu.memory_space<vmem>>, %arg4: memref<128x128xbf16, #tpu.memory_space<vmem>>, %arg5: memref<1x128xf32, #tpu.memory_space<vmem>>, %arg6: memref<128x128xbf16, #tpu.memory_space<vmem>>, %arg7: memref<1x128xf32, #tpu.memory_space<vmem>>, %arg8: memref<128x1xf32, #tpu.memory_space<vmem>>, %arg9: memref<1x1xf32, #tpu.memory_space<vmem>>, %arg10: memref<256x1xf32, #tpu.memory_space<vmem>>) attributes {dimension_semantics = [#tpu.dimension_semantics<parallel>], iteration_bounds = array<i64: 1>, scalar_prefetch = 0 : i64, scratch_operands = 0 : i64, tpu.core_type = #tpu.core_type<tc>, window_params = [{transform_indices = @transform_0, window_bounds = array<i64: 256, 4>}, {pipeline_mode = #tpu.pipeline_mode<synchronous>, transform_indices = @transform_1, window_bounds = array<i64: 4, 128>}, {pipeline_mode = #tpu.pipeline_mode<synchronous>, transform_indices = @transform_2, window_bounds = array<i64: 1, 128>}, {pipeline_mode = #tpu.pipeline_mode<synchronous>, transform_indices = @transform_3, window_bounds = array<i64: 128, 128>}, {pipeline_mode = #tpu.pipeline_mode<synchronous>, transform_indices = @transform_4, window_bounds = array<i64: 1, 128>}, {pipeline_mode = #tpu.pipeline_mode<synchronous>, transform_indices = @transform_5, window_bounds = array<i64: 128, 128>}, {pipeline_mode = #tpu.pipeline_mode<synchronous>, transform_indices = @transform_6, window_bounds = array<i64: 1, 128>}, {pipeline_mode = #tpu.pipeline_mode<synchronous>, transform_indices = @transform_7, window_bounds = array<i64: 128, 1>}, {pipeline_mode = #tpu.pipeline_mode<synchronous>, transform_indices = @transform_8, window_bounds = array<i64: 1, 1>}, {transform_indices = @transform_9, window_bounds = array<i64: 256, 1>}]} {
    %c0 = arith.constant 0 : index
    %c0_0 = arith.constant 0 : index
    %0 = vector.load %arg1[%c0, %c0_0] : memref<256x4xf32, #tpu.memory_space<vmem>>, vector<256x4xf32>
    %1 = arith.truncf %0 : vector<256x4xf32> to vector<256x4xbf16>
    %c0_1 = arith.constant 0 : index
    %c0_2 = arith.constant 0 : index
    %2 = vector.load %arg2[%c0_1, %c0_2] : memref<4x128xbf16, #tpu.memory_space<vmem>>, vector<4x128xbf16>
    %cst = arith.constant dense<0.000000e+00> : vector<256x128xf32>
    %3 = tpu.matmul %1, %2, %cst {dimension_numbers = #tpu.dot_dimension_numbers<[1], [0], [0], [1], [0, 0, 1, 1], [], []>} : vector<256x4xbf16>, vector<4x128xbf16>, vector<256x128xf32> -> vector<256x128xf32>
    %c0_3 = arith.constant 0 : index
    %c0_4 = arith.constant 0 : index
    %4 = vector.load %arg3[%c0_3, %c0_4] : memref<1x128xf32, #tpu.memory_space<vmem>>, vector<1x128xf32>
    %5 = vector.broadcast %4 : vector<1x128xf32> to vector<256x128xf32>
    %6 = arith.addf %3, %5 : vector<256x128xf32>
    %cst_5 = arith.constant 0.000000e+00 : f32
    %7 = vector.broadcast %cst_5 : f32 to vector<256x128xf32>
    %8 = arith.maximumf %6, %7 : vector<256x128xf32>
    %9 = arith.truncf %8 : vector<256x128xf32> to vector<256x128xbf16>
    %c0_6 = arith.constant 0 : index
    %c0_7 = arith.constant 0 : index
    %10 = vector.load %arg4[%c0_6, %c0_7] : memref<128x128xbf16, #tpu.memory_space<vmem>>, vector<128x128xbf16>
    %cst_8 = arith.constant dense<0.000000e+00> : vector<256x128xf32>
    %11 = tpu.matmul %9, %10, %cst_8 {dimension_numbers = #tpu.dot_dimension_numbers<[1], [0], [0], [1], [0, 0, 1, 1], [], []>} : vector<256x128xbf16>, vector<128x128xbf16>, vector<256x128xf32> -> vector<256x128xf32>
    %c0_9 = arith.constant 0 : index
    %c0_10 = arith.constant 0 : index
    %12 = vector.load %arg5[%c0_9, %c0_10] : memref<1x128xf32, #tpu.memory_space<vmem>>, vector<1x128xf32>
    %13 = vector.broadcast %12 : vector<1x128xf32> to vector<256x128xf32>
    %14 = arith.addf %11, %13 : vector<256x128xf32>
    %cst_11 = arith.constant 0.000000e+00 : f32
    %15 = vector.broadcast %cst_11 : f32 to vector<256x128xf32>
    %16 = arith.maximumf %14, %15 : vector<256x128xf32>
    %17 = arith.truncf %16 : vector<256x128xf32> to vector<256x128xbf16>
    %c0_12 = arith.constant 0 : index
    %c0_13 = arith.constant 0 : index
    %18 = vector.load %arg6[%c0_12, %c0_13] : memref<128x128xbf16, #tpu.memory_space<vmem>>, vector<128x128xbf16>
    %cst_14 = arith.constant dense<0.000000e+00> : vector<256x128xf32>
    %19 = tpu.matmul %17, %18, %cst_14 {dimension_numbers = #tpu.dot_dimension_numbers<[1], [0], [0], [1], [0, 0, 1, 1], [], []>} : vector<256x128xbf16>, vector<128x128xbf16>, vector<256x128xf32> -> vector<256x128xf32>
    %c0_15 = arith.constant 0 : index
    %c0_16 = arith.constant 0 : index
    %20 = vector.load %arg7[%c0_15, %c0_16] : memref<1x128xf32, #tpu.memory_space<vmem>>, vector<1x128xf32>
    %21 = vector.broadcast %20 : vector<1x128xf32> to vector<256x128xf32>
    %22 = arith.addf %19, %21 : vector<256x128xf32>
    %cst_17 = arith.constant 0.000000e+00 : f32
    %23 = vector.broadcast %cst_17 : f32 to vector<256x128xf32>
    %24 = arith.maximumf %22, %23 : vector<256x128xf32>
    %c0_18 = arith.constant 0 : index
    %c0_19 = arith.constant 0 : index
    %25 = vector.load %arg8[%c0_18, %c0_19] : memref<128x1xf32, #tpu.memory_space<vmem>>, vector<128x1xf32>
    %cst_20 = arith.constant dense<0.000000e+00> : vector<256x1xf32>
    %26 = tpu.matmul %24, %25, %cst_20 {dimension_numbers = #tpu.dot_dimension_numbers<[1], [0], [0], [1], [0, 0, 1, 1], [], []>} : vector<256x128xf32>, vector<128x1xf32>, vector<256x1xf32> -> vector<256x1xf32>
    %c0_21 = arith.constant 0 : index
    %c0_22 = arith.constant 0 : index
    %27 = vector.load %arg9[%c0_21, %c0_22] : memref<1x1xf32, #tpu.memory_space<vmem>>, vector<1x1xf32>
    %28 = vector.broadcast %27 : vector<1x1xf32> to vector<256x1xf32>
    %29 = arith.addf %26, %28 : vector<256x1xf32>
    %c0_23 = arith.constant 0 : index
    %c0_24 = arith.constant 0 : index
    %30 = vector.load %arg10[%c0_23, %c0_24] : memref<256x1xf32, #tpu.memory_space<vmem>>, vector<256x1xf32>
    tpu.vector_store %arg10[%c0_23, %c0_24], %29 {strides = array<i32>} : memref<256x1xf32, #tpu.memory_space<vmem>>, vector<256x1xf32>,
    return
  }
  func.func @transform_0(%arg0: i32) -> (i32, i32) {
    %c0_i32 = arith.constant 0 : i32
    %c0_i32_0 = arith.constant 0 : i32
    return %arg0, %c0_i32 : i32, i32
  }
  func.func @transform_1(%arg0: i32) -> (i32, i32) {
    %c0_i32 = arith.constant 0 : i32
    %c0_i32_0 = arith.constant 0 : i32
    %c0_i32_1 = arith.constant 0 : i32
    return %c0_i32, %c0_i32_0 : i32, i32
  }
  func.func @transform_2(%arg0: i32) -> (i32, i32) {
    %c0_i32 = arith.constant 0 : i32
    %c0_i32_0 = arith.constant 0 : i32
    %c0_i32_1 = arith.constant 0 : i32
    return %c0_i32, %c0_i32_0 : i32, i32
  }
  func.func @transform_3(%arg0: i32) -> (i32, i32) {
    %c0_i32 = arith.constant 0 : i32
    %c0_i32_0 = arith.constant 0 : i32
    %c0_i32_1 = arith.constant 0 : i32
    return %c0_i32, %c0_i32_0 : i32, i32
  }
  func.func @transform_4(%arg0: i32) -> (i32, i32) {
    %c0_i32 = arith.constant 0 : i32
    %c0_i32_0 = arith.constant 0 : i32
    %c0_i32_1 = arith.constant 0 : i32
    return %c0_i32, %c0_i32_0 : i32, i32
  }
  func.func @transform_5(%arg0: i32) -> (i32, i32) {
    %c0_i32 = arith.constant 0 : i32
    %c0_i32_0 = arith.constant 0 : i32
    %c0_i32_1 = arith.constant 0 : i32
    return %c0_i32, %c0_i32_0 : i32, i32
  }
  func.func @transform_6(%arg0: i32) -> (i32, i32) {
    %c0_i32 = arith.constant 0 : i32
    %c0_i32_0 = arith.constant 0 : i32
    %c0_i32_1 = arith.constant 0 : i32
    return %c0_i32, %c0_i32_0 : i32, i32
  }
  func.func @transform_7(%arg0: i32) -> (i32, i32) {
    %c0_i32 = arith.constant 0 : i32
    %c0_i32_0 = arith.constant 0 : i32
    %c0_i32_1 = arith.constant 0 : i32
    return %c0_i32, %c0_i32_0 : i32, i32
  }
  func.func @transform_8(%arg0: i32) -> (i32, i32) {
    %c0_i32 = arith.constant 0 : i32
    %c0_i32_0 = arith.constant 0 : i32
    %c0_i32_1 = arith.constant 0 : i32
    return %c0_i32, %c0_i32_0 : i32, i32
  }
  func.func @transform_9(%arg0: i32) -> (i32, i32) {
    %c0_i32 = arith.constant 0 : i32
    %c0_i32_0 = arith.constant 0 : i32
    return %arg0, %c0_i32 : i32, i32
  }
}

</mosaic_0001>

<bundles_post_ra>
// kernel: tpu_custom_call.1
= control target key start
LH: loop header
LB: loop body
LE: loop exit
PB: predicated region body
PF: predicated region fallthrough
CT: control target
= control target key end

     0   :  { %vm140_vm0 = vcmask 1041408   ;;  %vm91_vm1 = vcmask 31744   ;;  %vm1145_vm2 = vcmask 7168   ;;  %s2167_s1 = inlined_call_operand.vmem [shape: bf16[4,128], index: 1, kind: input, shape index: {}]   ;;  %s2168_s0 = inlined_call_operand.vmem [shape: f32[256,4], index: 0, kind: input, shape index: {}]   ;;  %s2169_s3 = inlined_call_operand.vmem [shape: bf16[128,128], index: 3, kind: input, shape index: {}]   ;;  %s2170_s5 = inlined_call_operand.vmem [shape: bf16[128,128], index: 5, kind: input, shape index: {}]   ;;  %s2171_s2 = inlined_call_operand.vmem [shape: f32[1,128], index: 2, kind: input, shape index: {}]   ;;  %s2172_s7 = inlined_call_operand.vmem [shape: f32[128,1], index: 7, kind: input, shape index: {}]   ;;  %s2173_s4 = inlined_call_operand.vmem [shape: f32[1,128], index: 4, kind: input, shape index: {}]   ;;  %s2174_s8 = inlined_call_operand.<no memory space> [shape: f32[1,1], index: 8, kind: input, shape index: {}]   ;;  %s2175_s6 = inlined_call_operand.vmem [shape: f32[1,128], index: 6, kind: input, shape index: {}]   ;;  %s2176_s9 = inlined_call_operand.vmem [shape: f32[256,1], index: 9, kind: output, shape index: {}]  }
   0x1   :  { %v83_v0 = vld [vmem:[%s2167_s1] sm:$0x3]  ;;  %v36_v2 = vld [vmem:[%s2168_s0 + $0x8] sm:$0xff]  ;;  %v37_v5 = vld [vmem:[%s2168_s0 + $0x10] sm:$0xff] }
   0x2   :  { %v35_v1 = vld [vmem:[%s2168_s0] sm:$0xff]  ;;  %1589 = vmatprep.subr.msk.bf16.mxu0 %vm140_vm0, %v83_v0  ;;  %v142_v3 = vsel %vm140_vm0, %v83_v0, 0  ;;  %v38_v6 = vld [vmem:[%s2168_s0 + $0x18] sm:$0xff]  ;;  %v40_v9 = vld [vmem:[%s2168_s0 + $0x28] sm:$0xff] }
   0x3   :  { %v67_v4 = vpack.c.bf16 %v36_v2, %v35_v1  ;;  %v39_v7 = vld [vmem:[%s2168_s0 + $0x20] sm:$0xff]  ;;  %1332 = vmatpush3.bf16.msra.mxu0 %v142_v3  ;;  %v68_v8 = vpack.c.bf16 %v38_v6, %v37_v5  ;;  %v41_v11 = vld [vmem:[%s2168_s0 + $0x30] sm:$0xff]  ;;  %v42_v12 = vld [vmem:[%s2168_s0 + $0x38] sm:$0xff] }
   0x4   :  { %v69_v10 = vpack.c.bf16 %v40_v9, %v39_v7  ;;  %v43_v13 = vld [vmem:[%s2168_s0 + $0x40] sm:$0xff]  ;;  %v44_v14 = vld [vmem:[%s2168_s0 + $0x48] sm:$0xff]  ;;  %v70_v15 = vpack.c.bf16 %v42_v12, %v41_v11  ;;  %v45_v18 = vld [vmem:[%s2168_s0 + $0x50] sm:$0xff] }
   0x5   :  { %1333 = vmatprep.mubr.msk.bf16.mxu0 %vm91_vm1, %v67_v4  ;;  %v71_v16 = vpack.c.bf16 %v44_v14, %v43_v13  ;;  %v1590_v17 = vld [vmem:[%s2169_s3] sm:$0xff]   ;;  %v46_v19 = vld [vmem:[%s2168_s0 + $0x58] sm:$0xff]  ;;  %v1591_v20 = vld [vmem:[%s2169_s3 + $0x8] sm:$0xff]  }
   0x6   :  { %1334 = vmatmul.mubr.msk.bf16.vlgmr.msra.gmra.mrb[0].mxu0 %vm91_vm1, %v68_v8  ;;  %v47_v21 = vld [vmem:[%s2168_s0 + $0x60] sm:$0xff]  ;;  %1365 = vmatprep.subr.bf16.mxu1 %v1590_v17  ;;  %v48_v22 = vld [vmem:[%s2168_s0 + $0x68] sm:$0xff]  ;;  %v1592_v23 = vld [vmem:[%s2169_s3 + $0x10] sm:$0xff]   ;;  %v72_v24 = vpack.c.bf16 %v46_v19, %v45_v18 }
   0x7   :  { %1337 = vmatprep.mubr.msk.bf16.mxu0 %vm91_vm1, %v69_v10  ;;  %1366 = vmatpush3.bf16.msra.mxu1 %v1590_v17  ;;  %v73_v25 = vpack.c.bf16 %v48_v22, %v47_v21  ;;  %v1593_v26 = vld [vmem:[%s2169_s3 + $0x18] sm:$0xff]   ;;  %v49_v27 = vld [vmem:[%s2168_s0 + $0x70] sm:$0xff]  ;;  %v51_v29 = vld [vmem:[%s2168_s0 + $0x80] sm:$0xff] }
   0x8   :  { %1367 = vmatprep.subr.bf16.mxu1 %v1591_v20  ;;  %v50_v28 = vld [vmem:[%s2168_s0 + $0x78] sm:$0xff]  ;;  %v52_v30 = vld [vmem:[%s2168_s0 + $0x88] sm:$0xff]  ;;  %v1594_v31 = vld [vmem:[%s2169_s3 + $0x20] sm:$0xff]  }
   0x9   :  { %v74_v32 = vpack.c.bf16 %v50_v28, %v49_v27  ;;  %v75_v33 = vpack.c.bf16 %v52_v30, %v51_v29  ;;  %v1595_v34 = vld [vmem:[%s2169_s3 + $0x28] sm:$0xff]   ;;  %v53_v35 = vld [vmem:[%s2168_s0 + $0x90] sm:$0xff]  ;;  %v54_v36 = vld [vmem:[%s2168_s0 + $0x98] sm:$0xff] }
   0xa   :  { %v55_v37 = vld [vmem:[%s2168_s0 + $0xa0] sm:$0xff]  ;;  %v56_v38 = vld [vmem:[%s2168_s0 + $0xa8] sm:$0xff]  ;;  %v76_v39 = vpack.c.bf16 %v54_v36, %v53_v35  ;;  %v57_v41 = vld [vmem:[%s2168_s0 + $0xb0] sm:$0xff] }
   0xb   :  { %1368 = vmatpush3.bf16.msra.mxu1 %v1591_v20  ;;  %v77_v40 = vpack.c.bf16 %v56_v38, %v55_v37  ;;  %v58_v42 = vld [vmem:[%s2168_s0 + $0xb8] sm:$0xff]  ;;  %v59_v43 = vld [vmem:[%s2168_s0 + $0xc0] sm:$0xff]  ;;  %v60_v44 = vld [vmem:[%s2168_s0 + $0xc8] sm:$0xff] }
   0xc   :  { %1369 = vmatprep.subr.bf16.mxu1 %v1592_v23  ;;  %v78_v45 = vpack.c.bf16 %v58_v42, %v57_v41  ;;  %v79_v46 = vpack.c.bf16 %v60_v44, %v59_v43  ;;  %v61_v47 = vld [vmem:[%s2168_s0 + $0xd0] sm:$0xff]  ;;  %v62_v48 = vld [vmem:[%s2168_s0 + $0xd8] sm:$0xff]  ;;  %v63_v49 = vld [vmem:[%s2168_s0 + $0xe0] sm:$0xff] }
   0xd   :  { %v64_v50 = vld [vmem:[%s2168_s0 + $0xe8] sm:$0xff]  ;;  %v80_v51 = vpack.c.bf16 %v62_v48, %v61_v47  ;;  %v65_v53 = vld [vmem:[%s2168_s0 + $0xf0] sm:$0xff]  ;;  %v66_v54 = vld [vmem:[%s2168_s0 + $0xf8] sm:$0xff] }
   0xe   :  { %1338 = vmatmul.mubr.msk.bf16.gmra.mrb[4].mxu0 %vm91_vm1, %v70_v15  ;;  %v81_v52 = vpack.c.bf16 %v64_v50, %v63_v49  ;;  %v82_v55 = vpack.c.bf16 %v66_v54, %v65_v53  ;;  %v1596_v56 = vld [vmem:[%s2169_s3 + $0x30] sm:$0xff]   ;;  %v1597_v57 = vld [vmem:[%s2169_s3 + $0x38] sm:$0xff]   ;;  %v1598_v58 = vld [vmem:[%s2170_s5] sm:$0xff]  }
   0xf   :  { %1341 = vmatprep.mubr.msk.bf16.mxu0 %vm91_vm1, %v71_v16  ;;  %1370 = vmatpush3.bf16.msra.mxu1 %v1592_v23  ;;  %v1599_v59 = vld [vmem:[%s2170_s5 + $0x8] sm:$0xff]   ;;  %v1600_v60 = vld [vmem:[%s2170_s5 + $0x10] sm:$0xff]   ;;  %v1601_v61 = vld [vmem:[%s2170_s5 + $0x18] sm:$0xff]  }
  0x10   :  { %1371 = vmatprep.subr.bf16.mxu1 %v1593_v26  ;;  %1413 = vmatprep.subr.bf16.mxu0 %v1598_v58  ;;  %v1602_v62 = vld [vmem:[%s2170_s5 + $0x20] sm:$0xff]   ;;  %v1603_v63 = vld [vmem:[%s2170_s5 + $0x28] sm:$0xff]   ;;  %v1604_v0 = vld [vmem:[%s2170_s5 + $0x30] sm:$0xff]  }
  0x11   :  { %1414 = vmatpush3.bf16.msra.mxu0 %v1598_v58  ;;  %v1819_v1 = vld [vmem:[%s2171_s2] ss:$0 sm:$0xff] }
  0x12   :  { %1415 = vmatprep.subr.bf16.mxu0 %v1599_v59 }
  0x13   :  { %1372 = vmatpush3.bf16.msra.mxu1 %v1593_v26 }
  0x14   :  { %1373 = vmatprep.subr.bf16.mxu1 %v1594_v31 }
  0x15   :  { %1416 = vmatpush3.bf16.msra.mxu0 %v1599_v59 }
  0x16   :  { %1342 = vmatmul.mubr.msk.bf16.gmra.mrb[8].mxu0 %vm91_vm1, %v72_v24  ;;  %1417 = vmatprep.subr.bf16.mxu0 %v1600_v60 }
  0x17   :  { %1345 = vmatprep.mubr.msk.bf16.mxu0 %vm91_vm1, %v73_v25  ;;  %1374 = vmatpush3.bf16.msra.mxu1 %v1594_v31 }
  0x18   :  { %1375 = vmatprep.subr.bf16.mxu1 %v1595_v34 }
  0x19   :  { %1418 = vmatpush3.bf16.msra.mxu0 %v1600_v60 }
  0x1a   :  { %1419 = vmatprep.subr.bf16.mxu0 %v1601_v61 }
  0x1b   :  { %1376 = vmatpush3.bf16.msra.mxu1 %v1595_v34 }
  0x1c   :  { %1377 = vmatprep.subr.bf16.mxu1 %v1596_v56 }
  0x1d   :  { %1420 = vmatpush3.bf16.msra.mxu0 %v1601_v61 }
  0x1e   :  { %1346 = vmatmul.mubr.msk.bf16.gmra.mrb[12].mxu0 %vm91_vm1, %v74_v32  ;;  %1421 = vmatprep.subr.bf16.mxu0 %v1602_v62 }
  0x1f   :  { %1349 = vmatprep.mubr.msk.bf16.mxu0 %vm91_vm1, %v75_v33  ;;  %1378 = vmatpush3.bf16.msra.mxu1 %v1596_v56 }
  0x20   :  { %1379 = vmatprep.subr.bf16.mxu1 %v1597_v57 }
  0x21   :  { %1422 = vmatpush3.bf16.msra.mxu0 %v1602_v62 }
  0x22   :  { %1423 = vmatprep.subr.bf16.mxu0 %v1603_v63 }
  0x23   :  { %1380 = vmatpush3.bf16.msra.mxu1 %v1597_v57 }
  0x25   :  { %1424 = vmatpush3.bf16.msra.mxu0 %v1603_v63 }
  0x26   :  { %1350 = vmatmul.mubr.msk.bf16.gmra.mrb[16].mxu0 %vm91_vm1, %v76_v39  ;;  %1425 = vmatprep.subr.bf16.mxu0 %v1604_v0 }
  0x27   :  { %1353 = vmatprep.mubr.msk.bf16.mxu0 %vm91_vm1, %v77_v40 }
  0x29   :  { %1426 = vmatpush3.bf16.msra.mxu0 %v1604_v0 }
  0x2e   :  { %1354 = vmatmul.mubr.msk.bf16.gmra.mrb[20].mxu0 %vm91_vm1, %v78_v45 }
  0x2f   :  { %1357 = vmatprep.mubr.msk.bf16.mxu0 %vm91_vm1, %v79_v46 }
  0x36   :  { %1358 = vmatmul.mubr.msk.bf16.gmra.mrb[24].mxu0 %vm91_vm1, %v80_v51 }
  0x37   :  { %1361 = vmatprep.mubr.msk.bf16.mxu0 %vm91_vm1, %v81_v52 }
  0x3e   :  { %1362 = vmatmul.mubr.msk.bf16.gmra.mrb[28].mxu0 %vm91_vm1, %v82_v55 }
  0xd9   :  { %v1335_v2 = vpop.f32.mrb[0].mxu0 }
  0xda   :  { %v187_v3 = vadd.f32 %v1335_v2, %v1819_v1  ;;  %v178_v4 = vpop.f32.mrb[1].mxu0 }
  0xdb   :  { %v179_v5 = vadd.f32 %v1819_v1, %v178_v4  ;;  %v1336_v6 = vpop.f32.mrb[2].mxu0 }
  0xdc   :  { %v190_v7 = vadd.f32 %v1336_v6, %v1819_v1  ;;  %v181_v8 = vpop.f32.mrb[3].mxu0  ;;  %v307_v10 = vmax.f32 %v187_v3, 0.0 }
  0xdd   :  { %v182_v9 = vadd.f32 %v1819_v1, %v181_v8  ;;  %v305_v12 = vmax.f32 %v179_v5, 0.0 }
  0xde   :  { %v308_v11 = vmax.f32 %v190_v7, 0.0 }
  0xdf   :  { %v306_v13 = vmax.f32 %v182_v9, 0.0 }
  0xe0   :  { %v338_v14 = vpack.c.bf16 %v308_v11, %v307_v10 }
  0xe1   :  { %v1339_v15 = vpop.f32.mrb[4].mxu0  ;;  %v337_v16 = vpack.c.bf16 %v306_v13, %v305_v12 }
  0xe2   :  { %v203_v17 = vadd.f32 %v1339_v15, %v1819_v1  ;;  %v194_v18 = vpop.f32.mrb[5].mxu0 }
  0xe3   :  { %v195_v19 = vadd.f32 %v1819_v1, %v194_v18  ;;  %v1340_v20 = vpop.f32.mrb[6].mxu0  ;;  %1381 = vmatprep.mubr.bf16.mxu1 %v337_v16 }
  0xe4   :  { %v206_v21 = vadd.f32 %v1340_v20, %v1819_v1  ;;  %v197_v22 = vpop.f32.mrb[7].mxu0  ;;  %1382 = vmatmul.mubr.bf16.vlgmr.msra.gmra.mrb[0].mxu1 %v338_v14  ;;  %v311_v24 = vmax.f32 %v203_v17, 0.0 }
  0xe5   :  { %v198_v23 = vadd.f32 %v1819_v1, %v197_v22  ;;  %v309_v26 = vmax.f32 %v195_v19, 0.0 }
  0xe6   :  { %v312_v25 = vmax.f32 %v206_v21, 0.0 }
  0xe7   :  { %v310_v27 = vmax.f32 %v198_v23, 0.0 }
  0xe8   :  { %v340_v28 = vpack.c.bf16 %v312_v25, %v311_v24 }
  0xe9   :  { %v339_v29 = vpack.c.bf16 %v310_v27, %v309_v26  ;;  %v1343_v30 = vpop.f32.mrb[8].mxu0 }
  0xea   :  { %v219_v31 = vadd.f32 %v1343_v30, %v1819_v1  ;;  %v210_v32 = vpop.f32.mrb[9].mxu0 }
  0xeb   :  { %v211_v33 = vadd.f32 %v1819_v1, %v210_v32  ;;  %v1344_v34 = vpop.f32.mrb[10].mxu0  ;;  %1385 = vmatprep.mubr.bf16.mxu1 %v339_v29 }
  0xec   :  { %v222_v35 = vadd.f32 %v1344_v34, %v1819_v1  ;;  %v213_v36 = vpop.f32.mrb[11].mxu0  ;;  %1386 = vmatmul.mubr.bf16.gmra.mrb[4].mxu1 %v340_v28  ;;  %v315_v38 = vmax.f32 %v219_v31, 0.0 }
  0xed   :  { %v214_v37 = vadd.f32 %v1819_v1, %v213_v36  ;;  %v313_v40 = vmax.f32 %v211_v33, 0.0 }
  0xee   :  { %v316_v39 = vmax.f32 %v222_v35, 0.0 }
  0xef   :  { %v314_v41 = vmax.f32 %v214_v37, 0.0 }
  0xf0   :  { %v342_v42 = vpack.c.bf16 %v316_v39, %v315_v38 }
  0xf1   :  { %v341_v43 = vpack.c.bf16 %v314_v41, %v313_v40  ;;  %v1347_v44 = vpop.f32.mrb[12].mxu0 }
  0xf2   :  { %v235_v45 = vadd.f32 %v1347_v44, %v1819_v1  ;;  %v226_v46 = vpop.f32.mrb[13].mxu0 }
  0xf3   :  { %v227_v47 = vadd.f32 %v1819_v1, %v226_v46  ;;  %v1348_v48 = vpop.f32.mrb[14].mxu0  ;;  %1389 = vmatprep.mubr.bf16.mxu1 %v341_v43 }
  0xf4   :  { %v238_v49 = vadd.f32 %v1348_v48, %v1819_v1  ;;  %v229_v50 = vpop.f32.mrb[15].mxu0  ;;  %1390 = vmatmul.mubr.bf16.gmra.mrb[8].mxu1 %v342_v42  ;;  %v319_v52 = vmax.f32 %v235_v45, 0.0 }
  0xf5   :  { %v230_v51 = vadd.f32 %v1819_v1, %v229_v50  ;;  %v317_v54 = vmax.f32 %v227_v47, 0.0 }
  0xf6   :  { %v320_v53 = vmax.f32 %v238_v49, 0.0 }
  0xf7   :  { %v318_v55 = vmax.f32 %v230_v51, 0.0  ;;  %v1605_v51 = vld [vmem:[%s2170_s5 + $0x38] sm:$0xff]  }
  0xf8   :  { %v344_v56 = vpack.c.bf16 %v320_v53, %v319_v52  ;;  %1427 = vmatprep.subr.bf16.mxu0 %v1605_v51  ;;  %v897_v52 = vld [vmem:[%s2172_s7] sm:$0xff]  ;;  %v899_v53 = vld [vmem:[%s2172_s7 + $0x10] sm:$0xff] }
  0xf9   :  { %v343_v57 = vpack.c.bf16 %v318_v55, %v317_v54  ;;  %v1351_v58 = vpop.f32.mrb[16].mxu0  ;;  %1428 = vmatpush3.bf16.msra.mxu0 %v1605_v51  ;;  %v900_v55 = vld [vmem:[%s2172_s7 + $0x18] sm:$0xff] }
  0xfa   :  { %v251_v59 = vadd.f32 %v1351_v58, %v1819_v1  ;;  %v242_v60 = vpop.f32.mrb[17].mxu0  ;;  %v902_v58 = vld [vmem:[%s2172_s7 + $0x28] sm:$0xff] }
  0xfb   :  { %v243_v61 = vadd.f32 %v1819_v1, %v242_v60  ;;  %v1352_v62 = vpop.f32.mrb[18].mxu0  ;;  %1393 = vmatprep.mubr.bf16.mxu1 %v343_v57  ;;  %v901_v57 = vld [vmem:[%s2172_s7 + $0x20] sm:$0xff]  ;;  %v903_v60 = vld [vmem:[%s2172_s7 + $0x30] sm:$0xff] }
  0xfc   :  { %v254_v63 = vadd.f32 %v1352_v62, %v1819_v1  ;;  %v245_v0 = vpop.f32.mrb[19].mxu0  ;;  %1394 = vmatmul.mubr.bf16.gmra.mrb[12].mxu1 %v344_v56  ;;  %v323_v3 = vmax.f32 %v251_v59, 0.0  ;;  %v1545_v56 = vpack.c.bf16 %v900_v55, %v899_v53  ;;  %v1874_v59 = vpack.c.bf16 %v902_v58, %v901_v57 }
  0xfd   :  { %v246_v2 = vadd.f32 %v1819_v1, %v245_v0  ;;  %v321_v5 = vmax.f32 %v243_v61, 0.0  ;;  %v904_v61 = vld [vmem:[%s2172_s7 + $0x38] sm:$0xff]  ;;  %v906_v0 = vld [vmem:[%s2172_s7 + $0x48] sm:$0xff] }
  0xfe   :  { %v324_v4 = vmax.f32 %v254_v63, 0.0  ;;  %v1883_v62 = vpack.c.bf16 %v904_v61, %v903_v60  ;;  %v905_v63 = vld [vmem:[%s2172_s7 + $0x40] sm:$0xff] }
  0xff   :  { %v322_v6 = vmax.f32 %v246_v2, 0.0  ;;  %v1893_v2 = vpack.c.bf16 %v906_v0, %v905_v63 }
 0x100   :  { %v346_v7 = vpack.c.bf16 %v324_v4, %v323_v3  ;;  %v907_v3 = vld [vmem:[%s2172_s7 + $0x50] sm:$0xff]  ;;  %v908_v4 = vld [vmem:[%s2172_s7 + $0x58] sm:$0xff] }
 0x101   :  { %v345_v8 = vpack.c.bf16 %v322_v6, %v321_v5  ;;  %v1355_v9 = vpop.f32.mrb[20].mxu0  ;;  %v1903_v5 = vpack.c.bf16 %v908_v4, %v907_v3  ;;  %v1911_v6 = vld [vmem:[%s2173_s4] ss:$0 sm:$0xff] }
 0x102   :  { %v267_v10 = vadd.f32 %v1355_v9, %v1819_v1  ;;  %v258_v11 = vpop.f32.mrb[21].mxu0 }
 0x103   :  { %v259_v12 = vadd.f32 %v1819_v1, %v258_v11  ;;  %v1356_v13 = vpop.f32.mrb[22].mxu0  ;;  %1397 = vmatprep.mubr.bf16.mxu1 %v345_v8 }
 0x104   :  { %v270_v14 = vadd.f32 %v1356_v13, %v1819_v1  ;;  %v261_v15 = vpop.f32.mrb[23].mxu0  ;;  %1398 = vmatmul.mubr.bf16.gmra.mrb[16].mxu1 %v346_v7  ;;  %v327_v17 = vmax.f32 %v267_v10, 0.0 }
 0x105   :  { %v262_v16 = vadd.f32 %v1819_v1, %v261_v15  ;;  %v325_v19 = vmax.f32 %v259_v12, 0.0 }
 0x106   :  { %v328_v18 = vmax.f32 %v270_v14, 0.0 }
 0x107   :  { %v326_v20 = vmax.f32 %v262_v16, 0.0 }
 0x108   :  { %v348_v21 = vpack.c.bf16 %v328_v18, %v327_v17 }
 0x109   :  { %v347_v22 = vpack.c.bf16 %v326_v20, %v325_v19  ;;  %v1359_v23 = vpop.f32.mrb[24].mxu0 }
 0x10a   :  { %v283_v24 = vadd.f32 %v1359_v23, %v1819_v1  ;;  %v274_v25 = vpop.f32.mrb[25].mxu0 }
 0x10b   :  { %v275_v26 = vadd.f32 %v1819_v1, %v274_v25  ;;  %v1360_v27 = vpop.f32.mrb[26].mxu0  ;;  %1401 = vmatprep.mubr.bf16.mxu1 %v347_v22 }
 0x10c   :  { %v286_v28 = vadd.f32 %v1360_v27, %v1819_v1  ;;  %v277_v29 = vpop.f32.mrb[27].mxu0  ;;  %1402 = vmatmul.mubr.bf16.gmra.mrb[20].mxu1 %v348_v21  ;;  %v331_v31 = vmax.f32 %v283_v24, 0.0 }
 0x10d   :  { %v278_v30 = vadd.f32 %v1819_v1, %v277_v29  ;;  %v329_v33 = vmax.f32 %v275_v26, 0.0 }
 0x10e   :  { %v332_v32 = vmax.f32 %v286_v28, 0.0 }
 0x10f   :  { %v330_v34 = vmax.f32 %v278_v30, 0.0 }
 0x110   :  { %v350_v35 = vpack.c.bf16 %v332_v32, %v331_v31 }
 0x111   :  { %v349_v36 = vpack.c.bf16 %v330_v34, %v329_v33  ;;  %v1363_v37 = vpop.f32.mrb[28].mxu0 }
 0x112   :  { %v299_v38 = vadd.f32 %v1363_v37, %v1819_v1  ;;  %v290_v39 = vpop.f32.mrb[29].mxu0 }
 0x113   :  { %v291_v40 = vadd.f32 %v1819_v1, %v290_v39  ;;  %v1364_v41 = vpop.f32.mrb[30].mxu0  ;;  %1405 = vmatprep.mubr.bf16.mxu1 %v349_v36 }
 0x114   :  { %v302_v42 = vadd.f32 %v1364_v41, %v1819_v1  ;;  %v293_v43 = vpop.f32.mrb[31].mxu0  ;;  %1406 = vmatmul.mubr.bf16.gmra.mrb[24].mxu1 %v350_v35  ;;  %v335_v45 = vmax.f32 %v299_v38, 0.0 }
 0x115   :  { %v294_v44 = vadd.f32 %v1819_v1, %v293_v43  ;;  %v333_v47 = vmax.f32 %v291_v40, 0.0  ;;  %v898_v1 = vld [vmem:[%s2172_s7 + $0x8] sm:$0xff] }
 0x116   :  { %v336_v46 = vmax.f32 %v302_v42, 0.0  ;;  %v1541_v54 = vpack.c.bf16 %v898_v1, %v897_v52 }
 0x117   :  { %v334_v48 = vmax.f32 %v294_v44, 0.0 }
 0x118   :  { %v352_v49 = vpack.c.bf16 %v336_v46, %v335_v45  ;;  %1573 = vmatprep.subr.bf16.mxu1 %v1541_v54  ;;  %1542 = vmatprep.subr.bf16.mxu0 %v1541_v54 }
 0x119   :  { %v351_v50 = vpack.c.bf16 %v334_v48, %v333_v47  ;;  %1581 = vmatpush3.bf16.msra.mxu1 %v1541_v54 }
 0x11a   :  { %1574 = vmatprep.subr.bf16.mxu1 %v1545_v56 }
 0x11b   :  { %1409 = vmatprep.mubr.bf16.mxu1 %v351_v50 }
 0x11c   :  { %1410 = vmatmul.mubr.bf16.gmra.mrb[28].mxu1 %v352_v49 }
 0x11d   :  { %1582 = vmatpush3.bf16.msra.mxu1 %v1545_v56 }
 0x11e   :  { %1575 = vmatprep.subr.bf16.mxu1 %v1874_v59 }
 0x121   :  { %1583 = vmatpush3.bf16.msra.mxu1 %v1874_v59 }
 0x122   :  { %1576 = vmatprep.subr.bf16.mxu1 %v1883_v62 }
 0x125   :  { %1584 = vmatpush3.bf16.msra.mxu1 %v1883_v62 }
 0x126   :  { %1577 = vmatprep.subr.bf16.mxu1 %v1893_v2 }
 0x129   :  { %1585 = vmatpush3.bf16.msra.mxu1 %v1893_v2 }
 0x12a   :  { %1578 = vmatprep.subr.bf16.mxu1 %v1903_v5 }
 0x12d   :  { %1586 = vmatpush3.bf16.msra.mxu1 %v1903_v5 }
 0x1b7   :  { %v1383_v7 = vpop.f32.mrb[0].mxu1 }
 0x1b8   :  { %v467_v8 = vadd.f32 %v1383_v7, %v1911_v6  ;;  %v458_v9 = vpop.f32.mrb[1].mxu1 }
 0x1b9   :  { %v459_v10 = vadd.f32 %v1911_v6, %v458_v9  ;;  %v1384_v11 = vpop.f32.mrb[2].mxu1 }
 0x1ba   :  { %v470_v12 = vadd.f32 %v1384_v11, %v1911_v6  ;;  %v461_v13 = vpop.f32.mrb[3].mxu1  ;;  %v587_v15 = vmax.f32 %v467_v8, 0.0 }
 0x1bb   :  { %v462_v14 = vadd.f32 %v1911_v6, %v461_v13  ;;  %v585_v17 = vmax.f32 %v459_v10, 0.0 }
 0x1bc   :  { %v588_v16 = vmax.f32 %v470_v12, 0.0 }
 0x1bd   :  { %v586_v18 = vmax.f32 %v462_v14, 0.0 }
 0x1be   :  { %v618_v19 = vpack.c.bf16 %v588_v16, %v587_v15 }
 0x1bf   :  { %v617_v20 = vpack.c.bf16 %v586_v18, %v585_v17  ;;  %v1387_v21 = vpop.f32.mrb[4].mxu1 }
 0x1c0   :  { %v483_v22 = vadd.f32 %v1387_v21, %v1911_v6  ;;  %v474_v23 = vpop.f32.mrb[5].mxu1 }
 0x1c1   :  { %v475_v24 = vadd.f32 %v1911_v6, %v474_v23  ;;  %v1388_v25 = vpop.f32.mrb[6].mxu1  ;;  %1429 = vmatprep.mubr.bf16.mxu0 %v617_v20 }
 0x1c2   :  { %v486_v26 = vadd.f32 %v1388_v25, %v1911_v6  ;;  %v477_v27 = vpop.f32.mrb[7].mxu1  ;;  %1430 = vmatmul.mubr.bf16.vlgmr.msra.gmra.mrb[32].mxu0 %v618_v19  ;;  %v591_v29 = vmax.f32 %v483_v22, 0.0 }
 0x1c3   :  { %v478_v28 = vadd.f32 %v1911_v6, %v477_v27  ;;  %1544 = vmatpush3.bf16.msra.mxu0 %v1541_v54  ;;  %v589_v31 = vmax.f32 %v475_v24, 0.0 }
 0x1c4   :  { %v592_v30 = vmax.f32 %v486_v26, 0.0  ;;  %1546 = vmatprep.subr.bf16.mxu0 %v1545_v56 }
 0x1c5   :  { %v590_v32 = vmax.f32 %v478_v28, 0.0 }
 0x1c6   :  { %v620_v33 = vpack.c.bf16 %v592_v30, %v591_v29 }
 0x1c7   :  { %v619_v34 = vpack.c.bf16 %v590_v32, %v589_v31  ;;  %v1391_v35 = vpop.f32.mrb[8].mxu1  ;;  %1548 = vmatpush3.bf16.msra.mxu0 %v1545_v56 }
 0x1c8   :  { %v499_v36 = vadd.f32 %v1391_v35, %v1911_v6  ;;  %v490_v37 = vpop.f32.mrb[9].mxu1  ;;  %1550 = vmatprep.subr.bf16.mxu0 %v1874_v59 }
 0x1c9   :  { %v491_v38 = vadd.f32 %v1911_v6, %v490_v37  ;;  %v1392_v39 = vpop.f32.mrb[10].mxu1  ;;  %1433 = vmatprep.mubr.bf16.mxu0 %v619_v34 }
 0x1ca   :  { %v502_v40 = vadd.f32 %v1392_v39, %v1911_v6  ;;  %v493_v41 = vpop.f32.mrb[11].mxu1  ;;  %1434 = vmatmul.mubr.bf16.gmra.mrb[36].mxu0 %v620_v33  ;;  %v595_v43 = vmax.f32 %v499_v36, 0.0 }
 0x1cb   :  { %v494_v42 = vadd.f32 %v1911_v6, %v493_v41  ;;  %1552 = vmatpush3.bf16.msra.mxu0 %v1874_v59  ;;  %v593_v45 = vmax.f32 %v491_v38, 0.0 }
 0x1cc   :  { %v596_v44 = vmax.f32 %v502_v40, 0.0  ;;  %1554 = vmatprep.subr.bf16.mxu0 %v1883_v62 }
 0x1cd   :  { %v594_v46 = vmax.f32 %v494_v42, 0.0 }
 0x1ce   :  { %v622_v47 = vpack.c.bf16 %v596_v44, %v595_v43 }
 0x1cf   :  { %v621_v48 = vpack.c.bf16 %v594_v46, %v593_v45  ;;  %v1395_v49 = vpop.f32.mrb[12].mxu1  ;;  %1556 = vmatpush3.bf16.msra.mxu0 %v1883_v62 }
 0x1d0   :  { %v515_v50 = vadd.f32 %v1395_v49, %v1911_v6  ;;  %v506_v51 = vpop.f32.mrb[13].mxu1  ;;  %1558 = vmatprep.subr.bf16.mxu0 %v1893_v2 }
 0x1d1   :  { %v507_v52 = vadd.f32 %v1911_v6, %v506_v51  ;;  %v1396_v1 = vpop.f32.mrb[14].mxu1  ;;  %1437 = vmatprep.mubr.bf16.mxu0 %v621_v48 }
 0x1d2   :  { %v518_v53 = vadd.f32 %v1396_v1, %v1911_v6  ;;  %v509_v54 = vpop.f32.mrb[15].mxu1  ;;  %1438 = vmatmul.mubr.bf16.gmra.mrb[40].mxu0 %v622_v47  ;;  %v599_v56 = vmax.f32 %v515_v50, 0.0 }
 0x1d3   :  { %v510_v55 = vadd.f32 %v1911_v6, %v509_v54  ;;  %1560 = vmatpush3.bf16.msra.mxu0 %v1893_v2  ;;  %v597_v58 = vmax.f32 %v507_v52, 0.0 }
 0x1d4   :  { %v600_v57 = vmax.f32 %v518_v53, 0.0  ;;  %1562 = vmatprep.subr.bf16.mxu0 %v1903_v5 }
 0x1d5   :  { %v598_v59 = vmax.f32 %v510_v55, 0.0  ;;  %v909_v55 = vld [vmem:[%s2172_s7 + $0x60] sm:$0xff] }
 0x1d6   :  { %v624_v60 = vpack.c.bf16 %v600_v57, %v599_v56  ;;  %v910_v56 = vld [vmem:[%s2172_s7 + $0x68] sm:$0xff] }
 0x1d7   :  { %v623_v61 = vpack.c.bf16 %v598_v59, %v597_v58  ;;  %v1399_v62 = vpop.f32.mrb[16].mxu1  ;;  %1564 = vmatpush3.bf16.msra.mxu0 %v1903_v5  ;;  %v1565_v57 = vpack.c.bf16 %v910_v56, %v909_v55  ;;  %v912_v58 = vld [vmem:[%s2172_s7 + $0x78] sm:$0xff] }
 0x1d8   :  { %v531_v63 = vadd.f32 %v1399_v62, %v1911_v6  ;;  %v522_v0 = vpop.f32.mrb[17].mxu1 }
 0x1d9   :  { %v523_v3 = vadd.f32 %v1911_v6, %v522_v0  ;;  %v1400_v4 = vpop.f32.mrb[18].mxu1  ;;  %1441 = vmatprep.mubr.bf16.mxu0 %v623_v61  ;;  %1566 = vmatprep.subr.bf16.mxu0 %v1565_v57  ;;  %v1971_v61 = vld [vmem:[%s2175_s6] ss:$0 sm:$0xff] }
 0x1da   :  { %v534_v2 = vadd.f32 %v1400_v4, %v1911_v6  ;;  %v525_v7 = vpop.f32.mrb[19].mxu1  ;;  %1442 = vmatmul.mubr.bf16.gmra.mrb[44].mxu0 %v624_v60  ;;  %v603_v9 = vmax.f32 %v531_v63, 0.0  ;;  %1579 = vmatprep.subr.bf16.mxu1 %v1565_v57  ;;  %v14_v60 = vstv %s2174_s8 }
 0x1db   :  { %v526_v8 = vadd.f32 %v1911_v6, %v525_v7  ;;  %v601_v11 = vmax.f32 %v523_v3, 0.0  ;;  %1568 = vmatpush3.bf16.msra.mxu0 %v1565_v57  ;;  %1587 = vmatpush3.bf16.msra.mxu1 %v1565_v57  ;;  %15 = vst [vmem:[#allocation2] sm:$0x1] %v14_v60 }
 0x1dc   :  { %v604_v10 = vmax.f32 %v534_v2, 0.0 }
 0x1dd   :  { %v602_v12 = vmax.f32 %v526_v8, 0.0 }
 0x1de   :  { %v626_v13 = vpack.c.bf16 %v604_v10, %v603_v9 }
 0x1df   :  { %v625_v14 = vpack.c.bf16 %v602_v12, %v601_v11  ;;  %v1403_v5 = vpop.f32.mrb[20].mxu1 }
 0x1e0   :  { %v547_v15 = vadd.f32 %v1403_v5, %v1911_v6  ;;  %v538_v16 = vpop.f32.mrb[21].mxu1 }
 0x1e1   :  { %v539_v17 = vadd.f32 %v1911_v6, %v538_v16  ;;  %v1404_v18 = vpop.f32.mrb[22].mxu1  ;;  %1445 = vmatprep.mubr.bf16.mxu0 %v625_v14 }
 0x1e2   :  { %v550_v19 = vadd.f32 %v1404_v18, %v1911_v6  ;;  %v541_v20 = vpop.f32.mrb[23].mxu1  ;;  %1446 = vmatmul.mubr.bf16.gmra.mrb[48].mxu0 %v626_v13  ;;  %v607_v22 = vmax.f32 %v547_v15, 0.0 }
 0x1e3   :  { %v542_v21 = vadd.f32 %v1911_v6, %v541_v20  ;;  %v605_v24 = vmax.f32 %v539_v17, 0.0 }
 0x1e4   :  { %v608_v23 = vmax.f32 %v550_v19, 0.0 }
 0x1e5   :  { %v606_v25 = vmax.f32 %v542_v21, 0.0 }
 0x1e6   :  { %v628_v26 = vpack.c.bf16 %v608_v23, %v607_v22 }
 0x1e7   :  { %v627_v27 = vpack.c.bf16 %v606_v25, %v605_v24  ;;  %v1407_v28 = vpop.f32.mrb[24].mxu1 }
 0x1e8   :  { %v563_v29 = vadd.f32 %v1407_v28, %v1911_v6  ;;  %v554_v30 = vpop.f32.mrb[25].mxu1 }
 0x1e9   :  { %v555_v31 = vadd.f32 %v1911_v6, %v554_v30  ;;  %v1408_v32 = vpop.f32.mrb[26].mxu1  ;;  %1449 = vmatprep.mubr.bf16.mxu0 %v627_v27 }
 0x1ea   :  { %v566_v33 = vadd.f32 %v1408_v32, %v1911_v6  ;;  %v557_v34 = vpop.f32.mrb[27].mxu1  ;;  %1450 = vmatmul.mubr.bf16.gmra.mrb[52].mxu0 %v628_v26  ;;  %v611_v36 = vmax.f32 %v563_v29, 0.0 }
 0x1eb   :  { %v558_v35 = vadd.f32 %v1911_v6, %v557_v34  ;;  %v609_v38 = vmax.f32 %v555_v31, 0.0 }
 0x1ec   :  { %v612_v37 = vmax.f32 %v566_v33, 0.0 }
 0x1ed   :  { %v610_v39 = vmax.f32 %v558_v35, 0.0 }
 0x1ee   :  { %v630_v40 = vpack.c.bf16 %v612_v37, %v611_v36 }
 0x1ef   :  { %v629_v41 = vpack.c.bf16 %v610_v39, %v609_v38  ;;  %v1411_v42 = vpop.f32.mrb[28].mxu1 }
 0x1f0   :  { %v579_v43 = vadd.f32 %v1411_v42, %v1911_v6  ;;  %v570_v44 = vpop.f32.mrb[29].mxu1 }
 0x1f1   :  { %v571_v45 = vadd.f32 %v1911_v6, %v570_v44  ;;  %v1412_v46 = vpop.f32.mrb[30].mxu1  ;;  %1453 = vmatprep.mubr.bf16.mxu0 %v629_v41 }
 0x1f2   :  { %v582_v47 = vadd.f32 %v1412_v46, %v1911_v6  ;;  %v573_v48 = vpop.f32.mrb[31].mxu1  ;;  %1454 = vmatmul.mubr.bf16.gmra.mrb[56].mxu0 %v630_v40  ;;  %v615_v50 = vmax.f32 %v579_v43, 0.0 }
 0x1f3   :  { %v574_v49 = vadd.f32 %v1911_v6, %v573_v48  ;;  %v613_v52 = vmax.f32 %v571_v45, 0.0  ;;  %v911_v6 = vld [vmem:[%s2172_s7 + $0x70] sm:$0xff] }
 0x1f4   :  { %v616_v51 = vmax.f32 %v582_v47, 0.0  ;;  %v1569_v59 = vpack.c.bf16 %v912_v58, %v911_v6 }
 0x1f5   :  { %v614_v1 = vmax.f32 %v574_v49, 0.0 }
 0x1f6   :  { %v632_v53 = vpack.c.bf16 %v616_v51, %v615_v50  ;;  %1570 = vmatprep.subr.bf16.mxu0 %v1569_v59  ;;  %1580 = vmatprep.subr.bf16.mxu1 %v1569_v59 }
 0x1f7   :  { %v631_v54 = vpack.c.bf16 %v614_v1, %v613_v52  ;;  %1572 = vmatpush3.bf16.msra.mxu0 %v1569_v59  ;;  %1588 = vmatpush3.bf16.msra.mxu1 %v1569_v59 }
 0x1f9   :  { %1457 = vmatprep.mubr.bf16.mxu0 %v631_v54 }
 0x1fa   :  { %1458 = vmatmul.mubr.bf16.gmra.mrb[60].mxu0 %v632_v53 }
 0x295   :  { %v1431_v62 = vpop.f32.mrb[32].mxu0 }
 0x296   :  { %v738_v63 = vpop.f32.mrb[33].mxu0  ;;  %v747_v4 = vadd.f32 %v1431_v62, %v1971_v61 }
 0x297   :  { %v739_v0 = vadd.f32 %v1971_v61, %v738_v63  ;;  %v1432_v3 = vpop.f32.mrb[34].mxu0 }
 0x298   :  { %v741_v2 = vpop.f32.mrb[35].mxu0  ;;  %v750_v9 = vadd.f32 %v1432_v3, %v1971_v61  ;;  %v867_v11 = vmax.f32 %v747_v4, 0.0 }
 0x299   :  { %v865_v7 = vmax.f32 %v739_v0, 0.0  ;;  %v742_v8 = vadd.f32 %v1971_v61, %v741_v2 }
 0x29a   :  { %v868_v5 = vmax.f32 %v750_v9, 0.0 }
 0x29b   :  { %v866_v10 = vmax.f32 %v742_v8, 0.0  ;;  %1493 = vmatprep.mubr.f32.mxu0 %v865_v7 }
 0x29d   :  { %v1435_v12 = vpop.f32.mrb[36].mxu0  ;;  %1494 = vmatmul.mubr.f32.vlgmr.msra.gmra.mrb[64].mxu0 %v866_v10 }
 0x29e   :  { %v763_v13 = vadd.f32 %v1435_v12, %v1971_v61  ;;  %v754_v14 = vpop.f32.mrb[37].mxu0  ;;  %1496 = vmatprep.mubr.f32.mxu0 %v867_v11 }
 0x29f   :  { %v755_v15 = vadd.f32 %v1971_v61, %v754_v14  ;;  %v1436_v16 = vpop.f32.mrb[38].mxu0 }
 0x2a0   :  { %v871_v17 = vmax.f32 %v763_v13, 0.0  ;;  %v766_v18 = vadd.f32 %v1436_v16, %v1971_v61  ;;  %v757_v19 = vpop.f32.mrb[39].mxu0 }
 0x2a1   :  { %v869_v20 = vmax.f32 %v755_v15, 0.0  ;;  %v758_v21 = vadd.f32 %v1971_v61, %v757_v19  ;;  %1497 = vmatmul.mubr.f32.gmra.mrb[66].mxu0 %v868_v5 }
 0x2a2   :  { %v872_v22 = vmax.f32 %v766_v18, 0.0  ;;  %1502 = vmatprep.mubr.f32.mxu1 %v871_v17 }
 0x2a3   :  { %v870_v23 = vmax.f32 %v758_v21, 0.0  ;;  %1499 = vmatprep.mubr.f32.mxu0 %v869_v20 }
 0x2a4   :  { %1503 = vmatmul.mubr.f32.vlgmr.msra.gmra.mrb[32].mxu1 %v872_v22 }
 0x2a5   :  { %v1439_v24 = vpop.f32.mrb[40].mxu0  ;;  %1500 = vmatmul.mubr.f32.gmra.mrb[68].mxu0 %v870_v23 }
 0x2a6   :  { %v770_v25 = vpop.f32.mrb[41].mxu0  ;;  %v779_v28 = vadd.f32 %v1439_v24, %v1971_v61 }
 0x2a7   :  { %v771_v26 = vadd.f32 %v1971_v61, %v770_v25  ;;  %v1440_v27 = vpop.f32.mrb[42].mxu0 }
 0x2a8   :  { %v773_v29 = vpop.f32.mrb[43].mxu0  ;;  %v782_v32 = vadd.f32 %v1440_v27, %v1971_v61  ;;  %v875_v34 = vmax.f32 %v779_v28, 0.0 }
 0x2a9   :  { %v873_v30 = vmax.f32 %v771_v26, 0.0  ;;  %v774_v31 = vadd.f32 %v1971_v61, %v773_v29 }
 0x2aa   :  { %v876_v37 = vmax.f32 %v782_v32, 0.0 }
 0x2ab   :  { %v874_v33 = vmax.f32 %v774_v31, 0.0  ;;  %1505 = vmatprep.mubr.f32.mxu1 %v873_v30 }
 0x2ad   :  { %v1443_v35 = vpop.f32.mrb[44].mxu0  ;;  %1506 = vmatmul.mubr.f32.gmra.mrb[34].mxu1 %v874_v33  ;;  %v2005_v33 = vld [vmem:[#allocation2] ss:$0 sm:$0xff] }
 0x2ae   :  { %v786_v36 = vpop.f32.mrb[45].mxu0  ;;  %1508 = vmatprep.mubr.f32.mxu1 %v875_v34  ;;  %v795_v40 = vadd.f32 %v1443_v35, %v1971_v61 }
 0x2af   :  { %v787_v38 = vadd.f32 %v1971_v61, %v786_v36  ;;  %v1444_v39 = vpop.f32.mrb[46].mxu0 }
 0x2b0   :  { %v789_v41 = vpop.f32.mrb[47].mxu0  ;;  %v798_v44 = vadd.f32 %v1444_v39, %v1971_v61  ;;  %v879_v46 = vmax.f32 %v795_v40, 0.0 }
 0x2b1   :  { %v877_v42 = vmax.f32 %v787_v38, 0.0  ;;  %v790_v43 = vadd.f32 %v1971_v61, %v789_v41  ;;  %1509 = vmatmul.mubr.f32.gmra.mrb[36].mxu1 %v876_v37 }
 0x2b2   :  { %v880_v49 = vmax.f32 %v798_v44, 0.0 }
 0x2b3   :  { %v878_v45 = vmax.f32 %v790_v43, 0.0  ;;  %1511 = vmatprep.mubr.f32.mxu1 %v877_v42 }
 0x2b5   :  { %v1447_v47 = vpop.f32.mrb[48].mxu0  ;;  %1512 = vmatmul.mubr.f32.gmra.mrb[38].mxu1 %v878_v45 }
 0x2b6   :  { %v802_v48 = vpop.f32.mrb[49].mxu0  ;;  %1514 = vmatprep.mubr.f32.mxu1 %v879_v46  ;;  %v811_v52 = vadd.f32 %v1447_v47, %v1971_v61 }
 0x2b7   :  { %v803_v50 = vadd.f32 %v1971_v61, %v802_v48  ;;  %v1448_v51 = vpop.f32.mrb[50].mxu0 }
 0x2b8   :  { %v805_v1 = vpop.f32.mrb[51].mxu0  ;;  %v814_v55 = vadd.f32 %v1448_v51, %v1971_v61  ;;  %v883_v57 = vmax.f32 %v811_v52, 0.0 }
 0x2b9   :  { %v881_v53 = vmax.f32 %v803_v50, 0.0  ;;  %v806_v54 = vadd.f32 %v1971_v61, %v805_v1  ;;  %1515 = vmatmul.mubr.f32.gmra.mrb[40].mxu1 %v880_v49 }
 0x2ba   :  { %v884_v59 = vmax.f32 %v814_v55, 0.0 }
 0x2bb   :  { %v882_v56 = vmax.f32 %v806_v54, 0.0  ;;  %1517 = vmatprep.mubr.f32.mxu1 %v881_v53 }
 0x2bd   :  { %v1451_v6 = vpop.f32.mrb[52].mxu0  ;;  %1518 = vmatmul.mubr.f32.gmra.mrb[42].mxu1 %v882_v56 }
 0x2be   :  { %v818_v58 = vpop.f32.mrb[53].mxu0  ;;  %1520 = vmatprep.mubr.f32.mxu1 %v883_v57  ;;  %v827_v63 = vadd.f32 %v1451_v6, %v1971_v61 }
 0x2bf   :  { %v819_v60 = vadd.f32 %v1971_v61, %v818_v58  ;;  %v1452_v62 = vpop.f32.mrb[54].mxu0 }
 0x2c0   :  { %v821_v0 = vpop.f32.mrb[55].mxu0  ;;  %v830_v2 = vadd.f32 %v1452_v62, %v1971_v61  ;;  %v887_v8 = vmax.f32 %v827_v63, 0.0 }
 0x2c1   :  { %v885_v3 = vmax.f32 %v819_v60, 0.0  ;;  %v822_v4 = vadd.f32 %v1971_v61, %v821_v0  ;;  %1521 = vmatmul.mubr.f32.gmra.mrb[44].mxu1 %v884_v59 }
 0x2c2   :  { %v888_v11 = vmax.f32 %v830_v2, 0.0 }
 0x2c3   :  { %v886_v7 = vmax.f32 %v822_v4, 0.0  ;;  %1523 = vmatprep.mubr.f32.mxu1 %v885_v3 }
 0x2c5   :  { %v1455_v9 = vpop.f32.mrb[56].mxu0  ;;  %1524 = vmatmul.mubr.f32.gmra.mrb[46].mxu1 %v886_v7 }
 0x2c6   :  { %v834_v10 = vpop.f32.mrb[57].mxu0  ;;  %1526 = vmatprep.mubr.f32.mxu1 %v887_v8  ;;  %v843_v14 = vadd.f32 %v1455_v9, %v1971_v61 }
 0x2c7   :  { %v835_v12 = vadd.f32 %v1971_v61, %v834_v10  ;;  %v1456_v13 = vpop.f32.mrb[58].mxu0 }
 0x2c8   :  { %v837_v5 = vpop.f32.mrb[59].mxu0  ;;  %v846_v17 = vadd.f32 %v1456_v13, %v1971_v61  ;;  %v891_v19 = vmax.f32 %v843_v14, 0.0 }
 0x2c9   :  { %v889_v15 = vmax.f32 %v835_v12, 0.0  ;;  %v838_v16 = vadd.f32 %v1971_v61, %v837_v5  ;;  %1527 = vmatmul.mubr.f32.gmra.mrb[48].mxu1 %v888_v11 }
 0x2ca   :  { %v892_v22 = vmax.f32 %v846_v17, 0.0 }
 0x2cb   :  { %v890_v18 = vmax.f32 %v838_v16, 0.0  ;;  %1529 = vmatprep.mubr.f32.mxu1 %v889_v15 }
 0x2cd   :  { %v1459_v20 = vpop.f32.mrb[60].mxu0  ;;  %1530 = vmatmul.mubr.f32.gmra.mrb[50].mxu1 %v890_v18 }
 0x2ce   :  { %v850_v21 = vpop.f32.mrb[61].mxu0  ;;  %1532 = vmatprep.mubr.f32.mxu1 %v891_v19  ;;  %v859_v25 = vadd.f32 %v1459_v20, %v1971_v61 }
 0x2cf   :  { %v851_v23 = vadd.f32 %v1971_v61, %v850_v21  ;;  %v1460_v24 = vpop.f32.mrb[62].mxu0 }
 0x2d0   :  { %v853_v26 = vpop.f32.mrb[63].mxu0  ;;  %v862_v29 = vadd.f32 %v1460_v24, %v1971_v61  ;;  %v895_v31 = vmax.f32 %v859_v25, 0.0 }
 0x2d1   :  { %v893_v27 = vmax.f32 %v851_v23, 0.0  ;;  %v854_v28 = vadd.f32 %v1971_v61, %v853_v26  ;;  %1533 = vmatmul.mubr.f32.gmra.mrb[52].mxu1 %v892_v22 }
 0x2d2   :  { %v896_v32 = vmax.f32 %v862_v29, 0.0 }
 0x2d3   :  { %v894_v30 = vmax.f32 %v854_v28, 0.0  ;;  %1535 = vmatprep.mubr.f32.mxu1 %v893_v27 }
 0x2d5   :  { %1536 = vmatmul.mubr.f32.gmra.mrb[54].mxu1 %v894_v30 }
 0x2d6   :  { %1538 = vmatprep.mubr.f32.mxu1 %v895_v31 }
 0x2d9   :  { %1539 = vmatmul.mubr.f32.gmra.mrb[56].mxu1 %v896_v32 }
 0x370   :  { %v1495_v34 = vpop.f32.mrb[64].mxu0 }
 0x371   :  { %v992_v35 = vadd.f32 %v1495_v34, %v2005_v33  ;;  %v986_v36 = vpop.f32.mrb[65].mxu0 }
 0x372   :  { %v987_v37 = vadd.f32 %v2005_v33, %v986_v36 }
 0x373   :  { %1147 = vst.msk [vmem:[%s2176_s9 + $0x8] sm:$0xff] %vm1145_vm2, %v992_v35 }
 0x374   :  { %1146 = vst.msk [vmem:[%s2176_s9] sm:$0xff] %vm1145_vm2, %v987_v37  ;;  %v1498_v61 = vpop.f32.mrb[66].mxu0 }
 0x375   :  { %v1002_v38 = vadd.f32 %v1498_v61, %v2005_v33  ;;  %v996_v39 = vpop.f32.mrb[67].mxu0 }
 0x376   :  { %v997_v40 = vadd.f32 %v2005_v33, %v996_v39 }
 0x377   :  { %1149 = vst.msk [vmem:[%s2176_s9 + $0x18] sm:$0xff] %vm1145_vm2, %v1002_v38  ;;  %v1504_v41 = vpop.f32.mrb[32].mxu1 }
 0x378   :  { %1148 = vst.msk [vmem:[%s2176_s9 + $0x10] sm:$0xff] %vm1145_vm2, %v997_v40  ;;  %v1022_v42 = vadd.f32 %v1504_v41, %v2005_v33  ;;  %v1501_v43 = vpop.f32.mrb[68].mxu0  ;;  %v1016_v44 = vpop.f32.mrb[33].mxu1 }
 0x379   :  { %v1012_v45 = vadd.f32 %v1501_v43, %v2005_v33  ;;  %v1017_v46 = vadd.f32 %v2005_v33, %v1016_v44  ;;  %v1006_v47 = vpop.f32.mrb[69].mxu0 }
 0x37a   :  { %1153 = vst.msk [vmem:[%s2176_s9 + $0x38] sm:$0xff] %vm1145_vm2, %v1022_v42  ;;  %v1007_v48 = vadd.f32 %v2005_v33, %v1006_v47 }
 0x37b   :  { %1151 = vst.msk [vmem:[%s2176_s9 + $0x28] sm:$0xff] %vm1145_vm2, %v1012_v45  ;;  %1152 = vst.msk [vmem:[%s2176_s9 + $0x30] sm:$0xff] %vm1145_vm2, %v1017_v46 }
 0x37c   :  { %1150 = vst.msk [vmem:[%s2176_s9 + $0x20] sm:$0xff] %vm1145_vm2, %v1007_v48 }
 0x380   :  { %v1507_v49 = vpop.f32.mrb[34].mxu1 }
 0x381   :  { %v1032_v50 = vadd.f32 %v1507_v49, %v2005_v33  ;;  %v1026_v51 = vpop.f32.mrb[35].mxu1 }
 0x382   :  { %v1027_v52 = vadd.f32 %v2005_v33, %v1026_v51 }
 0x383   :  { %1155 = vst.msk [vmem:[%s2176_s9 + $0x48] sm:$0xff] %vm1145_vm2, %v1032_v50 }
 0x384   :  { %1154 = vst.msk [vmem:[%s2176_s9 + $0x40] sm:$0xff] %vm1145_vm2, %v1027_v52  ;;  %v1510_v1 = vpop.f32.mrb[36].mxu1 }
 0x385   :  { %v1042_v53 = vadd.f32 %v1510_v1, %v2005_v33  ;;  %v1036_v54 = vpop.f32.mrb[37].mxu1 }
 0x386   :  { %v1037_v55 = vadd.f32 %v2005_v33, %v1036_v54 }
 0x387   :  { %1157 = vst.msk [vmem:[%s2176_s9 + $0x58] sm:$0xff] %vm1145_vm2, %v1042_v53 }
 0x388   :  { %1156 = vst.msk [vmem:[%s2176_s9 + $0x50] sm:$0xff] %vm1145_vm2, %v1037_v55  ;;  %v1513_v56 = vpop.f32.mrb[38].mxu1 }
 0x389   :  { %v1052_v57 = vadd.f32 %v1513_v56, %v2005_v33  ;;  %v1046_v6 = vpop.f32.mrb[39].mxu1 }
 0x38a   :  { %v1047_v58 = vadd.f32 %v2005_v33, %v1046_v6 }
 0x38b   :  { %1159 = vst.msk [vmem:[%s2176_s9 + $0x68] sm:$0xff] %vm1145_vm2, %v1052_v57 }
 0x38c   :  { %1158 = vst.msk [vmem:[%s2176_s9 + $0x60] sm:$0xff] %vm1145_vm2, %v1047_v58  ;;  %v1516_v59 = vpop.f32.mrb[40].mxu1 }
 0x38d   :  { %v1062_v60 = vadd.f32 %v1516_v59, %v2005_v33  ;;  %v1056_v62 = vpop.f32.mrb[41].mxu1 }
 0x38e   :  { %v1057_v63 = vadd.f32 %v2005_v33, %v1056_v62 }
 0x38f   :  { %1161 = vst.msk [vmem:[%s2176_s9 + $0x78] sm:$0xff] %vm1145_vm2, %v1062_v60 }
 0x390   :  { %1160 = vst.msk [vmem:[%s2176_s9 + $0x70] sm:$0xff] %vm1145_vm2, %v1057_v63  ;;  %v1519_v0 = vpop.f32.mrb[42].mxu1 }
 0x391   :  { %v1072_v3 = vadd.f32 %v1519_v0, %v2005_v33  ;;  %v1066_v4 = vpop.f32.mrb[43].mxu1 }
 0x392   :  { %v1067_v2 = vadd.f32 %v2005_v33, %v1066_v4 }
 0x393   :  { %1163 = vst.msk [vmem:[%s2176_s9 + $0x88] sm:$0xff] %vm1145_vm2, %v1072_v3 }
 0x394   :  { %1162 = vst.msk [vmem:[%s2176_s9 + $0x80] sm:$0xff] %vm1145_vm2, %v1067_v2  ;;  %v1522_v7 = vpop.f32.mrb[44].mxu1 }
 0x395   :  { %v1082_v8 = vadd.f32 %v1522_v7, %v2005_v33  ;;  %v1076_v9 = vpop.f32.mrb[45].mxu1 }
 0x396   :  { %v1077_v10 = vadd.f32 %v2005_v33, %v1076_v9 }
 0x397   :  { %1165 = vst.msk [vmem:[%s2176_s9 + $0x98] sm:$0xff] %vm1145_vm2, %v1082_v8 }
 0x398   :  { %1164 = vst.msk [vmem:[%s2176_s9 + $0x90] sm:$0xff] %vm1145_vm2, %v1077_v10  ;;  %v1525_v11 = vpop.f32.mrb[46].mxu1 }
 0x399   :  { %v1092_v12 = vadd.f32 %v1525_v11, %v2005_v33  ;;  %v1086_v13 = vpop.f32.mrb[47].mxu1 }
 0x39a   :  { %v1087_v14 = vadd.f32 %v2005_v33, %v1086_v13 }
 0x39b   :  { %1167 = vst.msk [vmem:[%s2176_s9 + $0xa8] sm:$0xff] %vm1145_vm2, %v1092_v12 }
 0x39c   :  { %1166 = vst.msk [vmem:[%s2176_s9 + $0xa0] sm:$0xff] %vm1145_vm2, %v1087_v14  ;;  %v1528_v5 = vpop.f32.mrb[48].mxu1 }
 0x39d   :  { %v1102_v15 = vadd.f32 %v1528_v5, %v2005_v33  ;;  %v1096_v16 = vpop.f32.mrb[49].mxu1 }
 0x39e   :  { %v1097_v17 = vadd.f32 %v2005_v33, %v1096_v16 }
 0x39f   :  { %1169 = vst.msk [vmem:[%s2176_s9 + $0xb8] sm:$0xff] %vm1145_vm2, %v1102_v15 }
 0x3a0   :  { %1168 = vst.msk [vmem:[%s2176_s9 + $0xb0] sm:$0xff] %vm1145_vm2, %v1097_v17  ;;  %v1531_v18 = vpop.f32.mrb[50].mxu1 }
 0x3a1   :  { %v1112_v19 = vadd.f32 %v1531_v18, %v2005_v33  ;;  %v1106_v20 = vpop.f32.mrb[51].mxu1 }
 0x3a2   :  { %v1107_v21 = vadd.f32 %v2005_v33, %v1106_v20 }
 0x3a3   :  { %1171 = vst.msk [vmem:[%s2176_s9 + $0xc8] sm:$0xff] %vm1145_vm2, %v1112_v19 }
 0x3a4   :  { %1170 = vst.msk [vmem:[%s2176_s9 + $0xc0] sm:$0xff] %vm1145_vm2, %v1107_v21  ;;  %v1534_v22 = vpop.f32.mrb[52].mxu1 }
 0x3a5   :  { %v1122_v23 = vadd.f32 %v1534_v22, %v2005_v33  ;;  %v1116_v24 = vpop.f32.mrb[53].mxu1 }
 0x3a6   :  { %v1117_v25 = vadd.f32 %v2005_v33, %v1116_v24 }
 0x3a7   :  { %1173 = vst.msk [vmem:[%s2176_s9 + $0xd8] sm:$0xff] %vm1145_vm2, %v1122_v23 }
 0x3a8   :  { %1172 = vst.msk [vmem:[%s2176_s9 + $0xd0] sm:$0xff] %vm1145_vm2, %v1117_v25  ;;  %v1537_v26 = vpop.f32.mrb[54].mxu1 }
 0x3a9   :  { %v1132_v27 = vadd.f32 %v1537_v26, %v2005_v33  ;;  %v1126_v28 = vpop.f32.mrb[55].mxu1 }
 0x3aa   :  { %v1127_v29 = vadd.f32 %v2005_v33, %v1126_v28 }
 0x3ab   :  { %1175 = vst.msk [vmem:[%s2176_s9 + $0xe8] sm:$0xff] %vm1145_vm2, %v1132_v27 }
 0x3ac   :  { %1174 = vst.msk [vmem:[%s2176_s9 + $0xe0] sm:$0xff] %vm1145_vm2, %v1127_v29  ;;  %v1540_v30 = vpop.f32.mrb[56].mxu1 }
 0x3ad   :  { %v1142_v31 = vadd.f32 %v1540_v30, %v2005_v33  ;;  %v1136_v32 = vpop.f32.mrb[57].mxu1 }
 0x3ae   :  { %v1137_v34 = vadd.f32 %v2005_v33, %v1136_v32 }
 0x3af   :  { %1177 = vst.msk [vmem:[%s2176_s9 + $0xf8] sm:$0xff] %vm1145_vm2, %v1142_v31 }
 0x3b0   :  { %1176 = vst.msk [vmem:[%s2176_s9 + $0xf0] sm:$0xff] %vm1145_vm2, %v1137_v34 }

</bundles_post_ra>
